<compile_context>
chip_gen: v6e
topology: v6e:2x2x1
jax: 0.10.0
libtpu: 0.0.40
codegen_flags: <defaults>
</compile_context>

<pallas_src>
import functools

import jax
import jax.numpy as jnp
from jax.experimental import pallas as pl
from jax.experimental.pallas import tpu as pltpu

EPS = 1e-10  # same eps as the PyTorch l2_norm helper


def _round_up(x, m):
    return (x + m - 1) // m * m


def _power_iter_kernel(wm_ref, u_ref, sig_ref, u_out_ref, v_out_ref, *,
                       power_iterations):
    """Power iteration + sigma.  Tiny (O(Cout*K)); runs once, outside the matmul grid.

    wm_ref : (Cout, K_pad) f32, zero-padded columns (padding is exact: contributes 0)
    u_ref  : (Cout, 1)     f32
    """
    wm = wm_ref[...]
    u = u_ref[...]
    for _ in range(power_iterations):          # static unroll, power_iterations >= 1
        # v = l2_norm(W^T u)
        wtu = jnp.sum(wm * u, axis=0, keepdims=True)                     # (1, K_pad)
        v = wtu / (jnp.sqrt(jnp.sum(wtu * wtu, keepdims=True)) + EPS)
        # u = l2_norm(W v)
        wv = jnp.sum(wm * v, axis=1, keepdims=True)                      # (Cout, 1)
        u = wv / (jnp.sqrt(jnp.sum(wv * wv, keepdims=True)) + EPS)
    sigma = jnp.sum(u * wv, keepdims=True)                               # (1, 1)
    sig_ref[...] = sigma
    u_out_ref[...] = u
    v_out_ref[...] = v


def _sn_matmul_kernel(w_ref, a_ref, b_ref, o_ref):
    """One lane-dense output tile of the conv-as-matmul.

    w_ref : (Cout, K_pad) bf16, already divided by sigma (resident across grid)
    a_ref : (K_pad, TM)   bf16  transposed im2col patches (streamed per tile)
    b_ref : (Cout, 1)     f32   bias (sublane broadcast)
    o_ref : (Cout, TM)    f32   lane-dense output tile
    """
    o_ref[...] = (
        jnp.dot(w_ref[...], a_ref[...], preferred_element_type=jnp.float32)
        + b_ref[...]
    )


def spectral_norm_conv2d(x, w, b, u, *, padding=1, power_iterations=1):
    """SpectralNorm(Conv2d(...)).forward(x).

    x : (N, Cin, H, W)  NCHW
    w : (Cout, Cin, KH, KW)  OIHW ("weight_bar")
    b : (Cout,) bias
    u : (Cout,) power-iteration buffer (l2-normalized at init, like _make_params)

    Returns (out_NCHW, sigma, u_new, v_new).
    """
    if power_iterations < 1:
        raise ValueError("power_iterations must be >= 1")

    x = x.astype(jnp.float32)
    N, Cin, H, W = x.shape
    Cout, _, KH, KW = w.shape
    Ho, Wo = H, W                       # stride 1, symmetric padding

    K = Cin * KH * KW
    M = N * Ho * Wo
    K_pad = _round_up(K, 128)           # dense lanes for the contraction dim

    # ---- im2col, built directly in transposed (K, M) layout ------------------
    # TODO(synk): fuse im2col into the matmul kernel (manual DMA of padded-x row
    # bands via memory_space=pl.ANY + make_async_copy) to avoid materialising the
    # KH*KW-times-inflated patch matrix in HBM.
    xp = jnp.pad(x, ((0, 0), (0, 0), (padding, padding), (padding, padding)))
    cols = [xp[:, :, kh:kh + Ho, kw:kw + Wo]            # (N, Cin, Ho, Wo)
            for kh in range(KH) for kw in range(KW)]
    S = jnp.stack(cols, axis=0)                         # (KH*KW, N, Cin, Ho, Wo)
    A_t = S.transpose(2, 0, 1, 3, 4).reshape(K, M)      # rows ordered (ci, kh, kw)

    # ---- tile sizing (budgeted for the smallest VMEM generation: v7x 64 MiB) --
    TM = min(512, _round_up(M, 128))

    def _working_set(tm):   # 2x-buffered A & out tiles + resident weight/bias
        return 2 * (K_pad * tm * 2 + Cout * tm * 4) + K_pad * Cout * 2 + Cout * 4

    budget = 48 * 1024 * 1024
    while TM > 128 and _working_set(TM) > budget:
        TM -= 128
    M_pad = _round_up(M, TM)

    A_t = jnp.pad(A_t, ((0, K_pad - K), (0, M_pad - M)))

    # ---- power iteration + sigma: single tiny pallas_call, all f32 -----------
    w_mat = w.reshape(Cout, K).astype(jnp.float32)
    w_pad = jnp.pad(w_mat, ((0, 0), (0, K_pad - K)))
    u_col = u.reshape(Cout, 1).astype(jnp.float32)

    vmem = pl.BlockSpec(memory_space=pltpu.MemorySpace.VMEM)
    sigma, u_new, v_new = pl.pallas_call(
        functools.partial(_power_iter_kernel, power_iterations=power_iterations),
        out_shape=(
            jax.ShapeDtypeStruct((1, 1), jnp.float32),       # sigma
            jax.ShapeDtypeStruct((Cout, 1), jnp.float32),    # updated u
            jax.ShapeDtypeStruct((1, K_pad), jnp.float32),   # updated v (padded)
        ),
        in_specs=[vmem, vmem],
        out_specs=(vmem,) * 3,
    )(w_pad, u_col)

    # pre-scale the weight ONCE (O(Cout*K)) and cast streamed operands to bf16
    w_sn = (w_pad / sigma[0, 0]).astype(jnp.bfloat16)        # (Cout, K_pad)
    a_bf16 = A_t.astype(jnp.bfloat16)                        # (K_pad, M_pad)
    b_col = b.reshape(Cout, 1).astype(jnp.float32)

    vmem_limit = int(min(48 * 1024 * 1024,
                         max(16 * 1024 * 1024,
                             2 * _working_set(TM) + 4 * 1024 * 1024)))

    # ---- tiled, pipelined conv-as-matmul with lane-dense (Cout, M) output ----
    o_t = pl.pallas_call(
        _sn_matmul_kernel,
        out_shape=jax.ShapeDtypeStruct((Cout, M_pad), jnp.float32),
        grid_spec=pltpu.PrefetchScalarGridSpec(
            num_scalar_prefetch=0,
            grid=(M_pad // TM,),
            in_specs=[
                pl.BlockSpec((Cout, K_pad), lambda i: (0, 0)),  # resident weight
                pl.BlockSpec((K_pad, TM), lambda i: (0, i)),    # streamed patches
                pl.BlockSpec((Cout, 1), lambda i: (0, 0)),      # resident bias
            ],
            out_specs=pl.BlockSpec((Cout, TM), lambda i: (0, i)),
        ),
        compiler_params=pltpu.CompilerParams(
            dimension_semantics=("parallel",),   # megacore-split on v7x, no-op on v5e/v6e
            vmem_limit_bytes=vmem_limit,
        ),
    )(w_sn, a_bf16, b_col)

    out = o_t[:, :M].reshape(Cout, N, Ho, Wo).transpose(1, 0, 2, 3)   # -> NCHW
    return out, sigma[0, 0], u_new.reshape(Cout), v_new[0, :K]


def _reference(x, w, b, u, power_iterations=1):
    """Pure-JAX reference reproducing the PyTorch module (f32, highest precision)."""
    Cout = w.shape[0]
    w_mat = w.reshape(Cout, -1)
    uu = u
    v = None
    for _ in range(power_iterations):
        v = w_mat.T @ uu
        v = v / (jnp.linalg.norm(v) + EPS)
        uu = w_mat @ v
        uu = uu / (jnp.linalg.norm(uu) + EPS)
    sigma = uu @ (w_mat @ v)
    w_sn = w / sigma
    out = jax.lax.conv_general_dilated(
        x, w_sn, window_strides=(1, 1), padding=((1, 1), (1, 1)),
        dimension_numbers=('NCHW', 'OIHW', 'NCHW'),
        precision=jax.lax.Precision.HIGHEST)
    return out + b.reshape(1, Cout, 1, 1), sigma


if __name__ == "__main__":
    key = jax.random.PRNGKey(0)
    k1, k2, k3, k4 = jax.random.split(key, 4)

    # small CIFAR-ish SpectralNorm(Conv2d(4, 8, 3, 1, 1)); N=3 so the M grid has
    # 2 tiles and exercises both the pipeline and the M-padding path.
    N, Cin, H, W = 3, 4, 16, 16
    Cout, KH, KW = 8, 3, 3

    x = jax.random.normal(k1, (N, Cin, H, W), jnp.float32)
    w = jax.random.normal(k2, (Cout, Cin, KH, KW), jnp.float32) * 0.1
    b = jax.random.normal(k3, (Cout,), jnp.float32) * 0.1
    u0 = jax.random.normal(k4, (Cout,), jnp.float32)
    u0 = u0 / (jnp.linalg.norm(u0) + EPS)    # _make_params l2-normalizes u at init

    out, sigma, u_new, v_new = spectral_norm_conv2d(x, w, b, u0,
                                                    power_iterations=1)
    out = jax.block_until_ready(out)

    ref_out, ref_sigma = _reference(x, w, b, u0, power_iterations=1)

    # sigma / power iteration are pure f32 -> tight tolerance
    assert jnp.allclose(sigma, ref_sigma, atol=1e-5, rtol=1e-5), (sigma, ref_sigma)
    # conv matmul uses bf16 inputs with f32 MXU accumulation -> looser tolerance
    assert jnp.allclose(out, ref_out, atol=2e-2, rtol=2e-2), \
        float(jnp.max(jnp.abs(out - ref_out)))

    print("KERNEL_OK")
</pallas_src>

<mosaic_0001>
module attributes {stable_mosaic.version = 11 : i64} {
  func.func @_power_iter_kernel(%arg0: memref<8x128xf32, #tpu.memory_space<vmem>>, %arg1: memref<8x1xf32, #tpu.memory_space<vmem>>, %arg2: memref<1x1xf32, #tpu.memory_space<vmem>>, %arg3: memref<8x1xf32, #tpu.memory_space<vmem>>, %arg4: memref<1x128xf32, #tpu.memory_space<vmem>>) attributes {dimension_semantics = [], scalar_prefetch = 0 : i64, scratch_operands = 0 : i64, tpu.core_type = #tpu.core_type<tc>} {
    %c0 = arith.constant 0 : index
    %c0_0 = arith.constant 0 : index
    %0 = vector.load %arg0[%c0, %c0_0] : memref<8x128xf32, #tpu.memory_space<vmem>>, vector<8x128xf32>
    %c0_1 = arith.constant 0 : index
    %c0_2 = arith.constant 0 : index
    %1 = vector.load %arg1[%c0_1, %c0_2] : memref<8x1xf32, #tpu.memory_space<vmem>>, vector<8x1xf32>
    %2 = vector.broadcast %1 : vector<8x1xf32> to vector<8x128xf32>
    %3 = arith.mulf %0, %2 : vector<8x128xf32>
    %cst = arith.constant dense<0.000000e+00> : vector<128xf32>
    %4 = vector.multi_reduction <add>, %3, %cst [0] : vector<8x128xf32> to vector<128xf32>
    %5 = vector.shape_cast %4 : vector<128xf32> to vector<1x128xf32>
    %6 = arith.mulf %5, %5 : vector<1x128xf32>
    %7 = vector.shape_cast %6 : vector<1x128xf32> to vector<1x1x128xf32>
    %cst_3 = arith.constant dense<0.000000e+00> : vector<1xf32>
    %8 = vector.multi_reduction <add>, %7, %cst_3 [1, 2] : vector<1x1x128xf32> to vector<1xf32>
    %9 = vector.shape_cast %8 : vector<1xf32> to vector<1x1x1xf32>
    %10 = vector.extract %9[0, 0, 0] : f32 from vector<1x1x1xf32>
    %11 = vector.broadcast %10 : f32 to vector<1x1xf32>
    %12 = math.sqrt %11 : vector<1x1xf32>
    %cst_4 = arith.constant 1.000000e-10 : f32
    %13 = vector.broadcast %cst_4 : f32 to vector<1x1xf32>
    %14 = arith.addf %12, %13 : vector<1x1xf32>
    %15 = vector.broadcast %14 : vector<1x1xf32> to vector<1x128xf32>
    %16 = arith.divf %5, %15 : vector<1x128xf32>
    %17 = vector.broadcast %16 : vector<1x128xf32> to vector<8x128xf32>
    %18 = arith.mulf %0, %17 : vector<8x128xf32>
    %cst_5 = arith.constant dense<0.000000e+00> : vector<8xf32>
    %19 = vector.multi_reduction <add>, %18, %cst_5 [1] : vector<8x128xf32> to vector<8xf32>
    %20 = vector.shape_cast %19 : vector<8xf32> to vector<8x1xf32>
    %21 = arith.mulf %20, %20 : vector<8x1xf32>
    %22 = vector.shape_cast %21 : vector<8x1xf32> to vector<1x8x1xf32>
    %cst_6 = arith.constant dense<0.000000e+00> : vector<1xf32>
    %23 = vector.multi_reduction <add>, %22, %cst_6 [1, 2] : vector<1x8x1xf32> to vector<1xf32>
    %24 = vector.shape_cast %23 : vector<1xf32> to vector<1x1x1xf32>
    %25 = vector.extract %24[0, 0, 0] : f32 from vector<1x1x1xf32>
    %26 = vector.broadcast %25 : f32 to vector<1x1xf32>
    %27 = math.sqrt %26 : vector<1x1xf32>
    %cst_7 = arith.constant 1.000000e-10 : f32
    %28 = vector.broadcast %cst_7 : f32 to vector<1x1xf32>
    %29 = arith.addf %27, %28 : vector<1x1xf32>
    %30 = vector.broadcast %29 : vector<1x1xf32> to vector<8x1xf32>
    %31 = arith.divf %20, %30 : vector<8x1xf32>
    %32 = arith.mulf %31, %20 : vector<8x1xf32>
    %33 = vector.shape_cast %32 : vector<8x1xf32> to vector<1x8x1xf32>
    %cst_8 = arith.constant dense<0.000000e+00> : vector<1xf32>
    %34 = vector.multi_reduction <add>, %33, %cst_8 [1, 2] : vector<1x8x1xf32> to vector<1xf32>
    %35 = vector.shape_cast %34 : vector<1xf32> to vector<1x1x1xf32>
    %36 = vector.extract %35[0, 0, 0] : f32 from vector<1x1x1xf32>
    %37 = vector.broadcast %36 : f32 to vector<1x1xf32>
    %c0_9 = arith.constant 0 : index
    %c0_10 = arith.constant 0 : index
    %38 = vector.load %arg2[%c0_9, %c0_10] : memref<1x1xf32, #tpu.memory_space<vmem>>, vector<1x1xf32>
    tpu.vector_store %arg2[%c0_9, %c0_10], %37 {strides = array<i32>} : memref<1x1xf32, #tpu.memory_space<vmem>>, vector<1x1xf32>,
    %c0_11 = arith.constant 0 : index
    %c0_12 = arith.constant 0 : index
    %39 = vector.load %arg3[%c0_11, %c0_12] : memref<8x1xf32, #tpu.memory_space<vmem>>, vector<8x1xf32>
    tpu.vector_store %arg3[%c0_11, %c0_12], %31 {strides = array<i32>} : memref<8x1xf32, #tpu.memory_space<vmem>>, vector<8x1xf32>,
    %c0_13 = arith.constant 0 : index
    %c0_14 = arith.constant 0 : index
    %40 = vector.load %arg4[%c0_13, %c0_14] : memref<1x128xf32, #tpu.memory_space<vmem>>, vector<1x128xf32>
    tpu.vector_store %arg4[%c0_13, %c0_14], %16 {strides = array<i32>} : memref<1x128xf32, #tpu.memory_space<vmem>>, vector<1x128xf32>,
    return
  }
}

</mosaic_0001>

<bundles_post_ra>
// kernel: tpu_custom_call.1
= control target key start
LH: loop header
LB: loop body
LE: loop exit
PB: predicated region body
PF: predicated region fallthrough
CT: control target
= control target key end

     0   :  { %10 = vsyncpa [#allocation3], 0  ;;  %s235_s0 = inlined_call_operand.vmem [shape: f32[8,128], index: 0, kind: input, shape index: {}]   ;;  %s236_s1 = inlined_call_operand.vmem [shape: f32[8,1], index: 1, kind: input, shape index: {}]   ;;  %s237_s2 = inlined_call_operand.hbm [shape: f32[1,1], index: 2, kind: output, shape index: {0}]   ;;  %s238_s3 = inlined_call_operand.vmem [shape: f32[8,1], index: 3, kind: output, shape index: {1}]   ;;  %s239_s4 = inlined_call_operand.hbm [shape: f32[1,128], index: 4, kind: output, shape index: {2}]  }
   0x1   :  { %v17_v0 = vld [vmem:[%s236_s1] sm:$0xff] }
   0x2   :  { %11 = vsyncpa [#allocation5], 0  ;;  %v189_v1 = vmov 0   ;;  %v16_v2 = vld [vmem:[%s235_s0] sm:$0xff]  ;;  %vm31_vm0 = vcmask 1040384   ;;  %vm57_vm3 = vcmask 7168  }
   0x3   :  { %136 = vset.pattern.permute.xlu0 %v189_v1  ;;  %s190_s21 = smov [#allocation4]  }
   0x4   :  { %20 = vperm.xlu0 %136, %v17_v0   ;;  %s113_s22 = sshll.u32 %s190_s21, 4  ;;  %s114_s22 = int_to_ptr.vmem [resolvable:$true] %s113_s22 }
   0x5   :  { %s145_s23 = scalar_lea.vmem %s114_s22, 16  ;;  %s149_s24 = scalar_lea.vmem %s114_s22, 32 }
   0x6   :  { %p146_p0 = scmp.ne.s32.totalorder %s114_s22, %s145_s23  ;;  %p150_p1 = scmp.lt.s32.totalorder %s114_s22, %s114_s22 }
   0x7   :  { %p151_p2 = scmp.lt.s32.totalorder %s149_s24, %s145_s23 }
   0x9   :  { %p152_p3 = por %p151_p2, %p150_p1 }
   0xb   :  { %p153_p4 = pnand %p152_p3, %p146_p0 }
  0x7f   :  { %v21_v3 = vpop.permute.xlu0 %20 }
  0x80   :  { %v23_v4 = vmul.f32 %v21_v3, %v16_v2 }
  0x82   :  { %v24_v5 = vrot.slane %v23_v4, 4 }
  0x84   :  { %v25_v6 = vadd.f32 %v24_v5, %v23_v4 }
  0x86   :  { %v26_v7 = vrot.slane %v25_v6, 2 }
  0x88   :  { %v27_v8 = vadd.f32 %v26_v7, %v25_v6 }
  0x8a   :  { %v28_v9 = vrot.slane %v27_v8, 1 }
  0x8c   :  { %v29_v10 = vadd.f32 %v28_v9, %v27_v8 }
  0x8e   :  { %v30_v11 = vmul.f32 %v29_v10, %v29_v10 }
  0x90   :  { %v32_v12 = vsel %vm31_vm0, %v30_v11, 0.0 }
  0x91   :  { %33 = vadd.xlane.f32.xlu0 %v32_v12 }
 0x11a   :  { %v34_v13 = vpop.xlane.xlu0 %33 }
 0x11b   :  { %v35_v14 = vrot.slane %v34_v13, 4 }
 0x11d   :  { %v36_v15 = vadd.f32 %v35_v14, %v34_v13 }
 0x11f   :  { %v37_v16 = vrot.slane %v36_v15, 2 }
 0x121   :  { %v38_v17 = vadd.f32 %v37_v16, %v36_v15 }
 0x123   :  { %v39_v18 = vrot.slane %v38_v17, 1 }
 0x125   :  { %v40_v19 = vadd.f32 %v39_v18, %v38_v17 }
 0x127   :  { %127 = vpush %v40_v19 }
 0x158   :  { %s128_s0 = spop %127 }
 0x159   :  { %v42_v20 = vstv %s128_s0 }
 0x15a   :  { %137 = vrsqrt.f32 %v42_v20  ;;  %vm45_vm1 = vcmp.eq.f32.partialorder %v42_v20, inf  ;;  %v48_v23 = vand.u32 2147483648, %v42_v20  ;;  %vm47_vm2 = vcmp.eq.f32.partialorder %v42_v20, 0.0 }
 0x167   :  { %v138_v21 = vpop.eup %137 }
 0x168   :  { %v44_v22 = vmul.f32 %v138_v21, %v42_v20 }
 0x16a   :  { %v46_v24 = vsel %vm45_vm1, %v42_v20, %v44_v22 }
 0x16b   :  { %v49_v25 = vsel %vm47_vm2, %v48_v23, %v46_v24 }
 0x16c   :  { %v50_v26 = vadd.f32 1e-10, %v49_v25 }
 0x16e   :  { %139 = vrcp.f32 %v50_v26 }
 0x17b   :  { %v140_v27 = vpop.eup %139 }
 0x17c   :  { %v52_v28 = vmul.f32 %v140_v27, %v29_v10 }
 0x17e   :  { %v53_v29 = vmul.f32 %v52_v28, %v16_v2  ;;  %94 = vst [vmem:[#allocation4] sm:$0x1] %v52_v28 }
 0x180   :  { %54 = vadd.xlane.f32.xlu1 %v53_v29 }
 0x209   :  { %v55_v30 = vpop.xlane.xlu1 %54 }
 0x20a   :  { %v56_v31 = vmul.f32 %v55_v30, %v55_v30 }
 0x20c   :  { %v58_v32 = vsel %vm57_vm3, %v56_v31, 0.0 }
 0x20d   :  { %59 = vadd.xlane.f32.xlu1 %v58_v32 }
 0x296   :  { %v60_v33 = vpop.xlane.xlu1 %59 }
 0x297   :  { %v61_v34 = vrot.slane %v60_v33, 4 }
 0x299   :  { %v62_v35 = vadd.f32 %v61_v34, %v60_v33 }
 0x29b   :  { %v63_v36 = vrot.slane %v62_v35, 2 }
 0x29d   :  { %v64_v37 = vadd.f32 %v63_v36, %v62_v35 }
 0x29f   :  { %v65_v38 = vrot.slane %v64_v37, 1 }
 0x2a1   :  { %v66_v39 = vadd.f32 %v65_v38, %v64_v37 }
 0x2a3   :  { %129 = vpush %v66_v39 }
 0x2d4   :  { %s130_s1 = spop %129 }
 0x2d5   :  { %v68_v40 = vstv %s130_s1 }
 0x2d6   :  { %141 = vrsqrt.f32 %v68_v40  ;;  %vm71_vm4 = vcmp.eq.f32.partialorder %v68_v40, inf  ;;  %v74_v43 = vand.u32 2147483648, %v68_v40  ;;  %vm73_vm5 = vcmp.eq.f32.partialorder %v68_v40, 0.0 }
 0x2e3   :  { %v142_v41 = vpop.eup %141 }
 0x2e4   :  { %v70_v42 = vmul.f32 %v142_v41, %v68_v40 }
 0x2e6   :  { %v72_v44 = vsel %vm71_vm4, %v68_v40, %v70_v42 }
 0x2e7   :  { %v75_v45 = vsel %vm73_vm5, %v74_v43, %v72_v44 }
 0x2e8   :  { %v76_v46 = vadd.f32 1e-10, %v75_v45 }
 0x2ea   :  { %143 = vrcp.f32 %v76_v46 }
 0x2f7   :  { %v144_v47 = vpop.eup %143 }
 0x2f8   :  { %v78_v48 = vmul.f32 %v144_v47, %v55_v30 }
 0x2fa   :  { %v79_v49 = vmul.f32 %v78_v48, %v55_v30  ;;  %93 = vst.msk [vmem:[%s238_s3] sm:$0xff] %vm57_vm3, %v78_v48 }
 0x2fc   :  { %v80_v50 = vsel %vm57_vm3, %v79_v49, 0.0 }
 0x2fd   :  { %81 = vadd.xlane.f32.xlu1 %v80_v50 }
 0x2fe   :  { %156 = shalt.err (!%p153_p4)
}
 0x2ff   :  { %116 = dma.vmem_to_hbm [thread:$0]  %s114_s22, 16, %s239_s4, [#allocation5]   ;;  %vm91_vm6 = vcmask 0  }
 0x300   :  { %s191_s3 = smov [#allocation2]  }
 0x301   :  { %s101_s27 = sshll.u32 %s191_s3, 4  ;;  %s102_s27 = int_to_ptr.vmem [resolvable:$true] %s101_s27 }
 0x302   :  { %s165_s29 = scalar_lea.vmem %s102_s27, 16  ;;  %s169_s30 = scalar_lea.vmem %s102_s27, 32 }
 0x303   :  { %p166_p5 = scmp.ne.s32.totalorder %s102_s27, %s165_s29  ;;  %p170_p6 = scmp.lt.s32.totalorder %s102_s27, %s102_s27 }
 0x304   :  { %p171_p7 = scmp.lt.s32.totalorder %s169_s30, %s165_s29 }
 0x306   :  { %p172_p8 = por %p171_p7, %p170_p6 }
 0x308   :  { %p173_p9 = pnand %p172_p8, %p166_p5 }
 0x386   :  { %v82_v51 = vpop.xlane.xlu1 %81 }
 0x387   :  { %v83_v52 = vrot.slane %v82_v51, 4 }
 0x389   :  { %v84_v53 = vadd.f32 %v83_v52, %v82_v51 }
 0x38b   :  { %v85_v54 = vrot.slane %v84_v53, 2 }
 0x38d   :  { %v86_v55 = vadd.f32 %v85_v54, %v84_v53 }
 0x38f   :  { %v87_v56 = vrot.slane %v86_v55, 1 }
 0x391   :  { %v88_v57 = vadd.f32 %v87_v56, %v86_v55 }
 0x393   :  { %131 = vpush %v88_v57 }
 0x3c4   :  { %s132_s28 = spop %131 }
 0x3c5   :  { %v90_v58 = vstv %s132_s28 }
 0x3c6   :  { %92 = vst.msk [vmem:[#allocation2] sm:$0x1] %vm91_vm6, %v90_v58 }
 0x3c7   :  { %176 = shalt.err (!%p173_p9)
}
 0x3c8   :  { %104 = dma.vmem_to_hbm [thread:$0]  %s102_s27, 16, %s237_s2, [#allocation3]  }
 0x3c9   :  { %185 = dma.done.wait [#allocation3], 16  }
 0x3ca   :  { %186 = vsyncadd [#allocation3], 4294967280 }
 0x3cb   :  { %187 = dma.done.wait [#allocation5], 16  }
 0x3cc   :  { %188 = vsyncadd [#allocation5], 4294967280 }
 0x3cd   :  { %125 = vsyncpa [#allocation3], 1 }
 0x3ce   :  { %126 = vsyncpa [#allocation5], 1 }

</bundles_post_ra>
